<compile_context>
chip_gen: v7x
topology: tpu7x:2x2x1
jax: 0.10.0
libtpu: 0.0.40
codegen_flags: <defaults>
</compile_context>

<pallas_src>
import functools

import jax
import jax.numpy as jnp
from jax.experimental import pallas as pl
from jax.experimental.pallas import tpu as pltpu


def _moving_avg_kernel(x_ref, o_ref, xpad_ref, w_ref, *,
                       kernel_size, stride, pad, seq_len, tl, halo, l_alloc):
    """One (lane_tile, time_tile) grid step.

    x_ref    : (L, lane_tile)         input, resident across the time axis
    o_ref    : (TL, lane_tile)        output time tile
    xpad_ref : (L_alloc, lane_tile)   scratch: replicate-padded sequence
    w_ref    : (TL, HALO) float32     scratch: banded 0/1 window matrix
    """
    lane = x_ref.shape[1]
    t = pl.program_id(1)

    @pl.when(t == 0)
    def _init():
        # (a) Replicate-padded sequence, built once per lane tile: bulk body
        #     via a local DMA (arbitrary row offset, no vreg pressure), tiny
        #     edge regions via broadcast stores.
        pltpu.sync_copy(x_ref, xpad_ref.at[pl.ds(pad, seq_len), :])
        if pad > 0:
            xpad_ref[pl.ds(0, pad), :] = jnp.broadcast_to(
                x_ref[0:1, :], (pad, lane))
        tail = l_alloc - (pad + seq_len)
        if tail > 0:
            xpad_ref[pl.ds(pad + seq_len, tail), :] = jnp.broadcast_to(
                x_ref[seq_len - 1:seq_len, :], (tail, lane))
        # (b) Banded window matrix: w[r, m] = 1 iff r*stride <= m < r*stride+K.
        r = jax.lax.broadcasted_iota(jnp.int32, (tl, halo), 0)
        m = jax.lax.broadcasted_iota(jnp.int32, (tl, halo), 1)
        band = (m >= r * stride) & (m < r * stride + kernel_size)
        w_ref[...] = band.astype(jnp.float32)

    # Padded rows feeding this output tile: [t*TL*stride, t*TL*stride + HALO).
    start = pl.multiple_of(t * (tl * stride), tl * stride)
    win = xpad_ref[pl.ds(start, halo), :].astype(jnp.float32)

    # One MXU pass computes the whole K-tap windowed sum for all TL rows; the
    # 1/K scale is applied afterwards on the VPU (keeps W exactly 0/1).
    acc = jnp.dot(w_ref[...], win, preferred_element_type=jnp.float32)
    o_ref[...] = (acc * jnp.float32(1.0 / kernel_size)).astype(o_ref.dtype)


def moving_avg(x, kernel_size, stride, *, time_tile=256, lane_tile_cap=512):
    """x: (B, L, C) -> (B, L_out, C); matches the PyTorch `moving_avg` module."""
    b, l, c = x.shape
    assert kernel_size >= 1 and stride >= 1
    pad = (kernel_size - 1) // 2
    l_pad = l + 2 * pad
    l_out = (l_pad - kernel_size) // stride + 1
    assert l_out >= 1

    # Lane-dense view: time on sublanes, batch*channels on lanes.
    bc = b * c
    xt = jnp.transpose(x, (1, 0, 2)).reshape(l, bc)

    # Lane tiling: second ("parallel") grid axis when the lane dim is wide.
    if bc > lane_tile_cap and bc % 128 == 0:
        lane_tile = max(d for d in range(128, lane_tile_cap + 1, 128)
                        if bc % d == 0)
    else:
        lane_tile = bc
    n_lane = bc // lane_tile

    # Time tiling of the output (full extent if it already fits one tile).
    if l_out > time_tile:
        tl = max(8, (time_tile // 8) * 8)
    else:
        tl = l_out
    n_time = pl.cdiv(l_out, tl)
    halo = (tl - 1) * stride + kernel_size          # padded rows per out tile
    # Scratch rows: enough for the padded sequence and the (possibly
    # overhanging) window of the last tile.
    l_alloc = max((n_time - 1) * tl * stride + halo, l_pad)
    # TODO(synk): for extremely long sequences (l * lane_tile * itemsize
    # approaching VMEM) also tile the *input* time axis with a halo instead of
    # keeping the full sequence resident.

    kernel = functools.partial(
        _moving_avg_kernel,
        kernel_size=kernel_size, stride=stride, pad=pad, seq_len=l,
        tl=tl, halo=halo, l_alloc=l_alloc)

    itemsize = jnp.dtype(x.dtype).itemsize
    cost = pl.CostEstimate(
        flops=2 * n_lane * n_time * tl * halo * lane_tile,
        transcendentals=0,
        bytes_accessed=(l * bc + l_out * bc) * itemsize)

    out_t = pl.pallas_call(
        kernel,
        out_shape=jax.ShapeDtypeStruct((l_out, bc), x.dtype),
        grid_spec=pltpu.PrefetchScalarGridSpec(
            num_scalar_prefetch=0,
            grid=(n_lane, n_time),
            in_specs=[pl.BlockSpec((l, lane_tile), lambda li, ti: (0, li))],
            out_specs=pl.BlockSpec((tl, lane_tile), lambda li, ti: (ti, li)),
            scratch_shapes=[
                pltpu.VMEM((l_alloc, lane_tile), x.dtype),   # padded sequence
                pltpu.VMEM((tl, halo), jnp.float32),         # band matrix
            ]),
        compiler_params=pltpu.CompilerParams(
            dimension_semantics=("parallel", "arbitrary"),
            vmem_limit_bytes=48 * 1024 * 1024),
        cost_estimate=cost,
    )(xt)

    # Back to (B, L_out, C).
    return out_t.reshape(l_out, b, c).transpose(1, 0, 2)


def _reference(x, kernel_size, stride):
    """Pure-JAX reference with the exact PyTorch-module math."""
    pad = (kernel_size - 1) // 2
    xp = jnp.concatenate(
        [jnp.repeat(x[:, :1], pad, axis=1), x,
         jnp.repeat(x[:, -1:], pad, axis=1)], axis=1)
    l_out = (x.shape[1] + 2 * pad - kernel_size) // stride + 1
    return jnp.stack(
        [jnp.mean(xp[:, t * stride:t * stride + kernel_size, :], axis=1)
         for t in range(l_out)], axis=1)


if __name__ == "__main__":
    key = jax.random.PRNGKey(0)
    k_data, k_data2 = jax.random.split(key)

    # Values on a 1/8 grid: window sums are then exact under any MXU pass
    # decomposition, so the correctness checks can stay tight.
    B, L, C = 2, 16, 8
    x = jnp.round(jax.random.normal(k_data, (B, L, C), dtype=jnp.float32) * 8.0) / 8.0

    # 1) Base config (kernel_size=5, stride=1), single time tile.
    out = jax.block_until_ready(moving_avg(x, kernel_size=5, stride=1))
    ref = _reference(x, 5, 1)
    assert out.shape == ref.shape, (out.shape, ref.shape)
    assert bool(jnp.allclose(out, ref, atol=1e-5, rtol=1e-5)), \
        float(jnp.max(jnp.abs(out - ref)))

    # 2) stride > 1 (dense window + row-offset band matrix, no strided gathers).
    out2 = jax.block_until_ready(moving_avg(x, kernel_size=5, stride=2))
    ref2 = _reference(x, 5, 2)
    assert out2.shape == ref2.shape, (out2.shape, ref2.shape)
    assert bool(jnp.allclose(out2, ref2, atol=1e-5, rtol=1e-5))

    # 3) Multi-tile time axis (forced small tile => 3 grid steps + overhang).
    x3 = jnp.round(jax.random.normal(k_data2, (2, 40, 8), dtype=jnp.float32) * 8.0) / 8.0
    out3 = jax.block_until_ready(moving_avg(x3, kernel_size=7, stride=1, time_tile=16))
    ref3 = _reference(x3, 7, 1)
    assert out3.shape == ref3.shape, (out3.shape, ref3.shape)
    assert bool(jnp.allclose(out3, ref3, atol=1e-5, rtol=1e-5))

    print("KERNEL_OK")
</pallas_src>

<mosaic_0001>
module attributes {stable_mosaic.version = 11 : i64} {
  func.func @_moving_avg_kernel(%arg0: i32, %arg1: i32, %arg2: memref<16x16xf32, #tpu.memory_space<vmem>>, %arg3: memref<16x16xf32, #tpu.memory_space<vmem>>, %arg4: memref<20x16xf32, #tpu.memory_space<vmem>>, %arg5: memref<16x20xf32, #tpu.memory_space<vmem>>) attributes {dimension_semantics = [#tpu.dimension_semantics<parallel>, #tpu.dimension_semantics<arbitrary>], iteration_bounds = array<i64: 1, 1>, scalar_prefetch = 0 : i64, scratch_operands = 2 : i64, tpu.core_type = #tpu.core_type<tc>, window_params = [{transform_indices = @transform_0, window_bounds = array<i64: 16, 16>}, {transform_indices = @transform_1, window_bounds = array<i64: 16, 16>}]} {
    %c0_i32 = arith.constant 0 : i32
    %0 = arith.cmpi eq, %arg1, %c0_i32 : i32
    %1 = arith.extui %0 : i1 to i32
    %c0_i32_0 = arith.constant 0 : i32
    %2 = arith.cmpi ne, %1, %c0_i32_0 : i32
    scf.if %2 {
      "tpu.region"() ({
        %34 = tpu.sem_alloc : memref<!tpu.dma_semaphore, #tpu.memory_space<semaphore_mem>>
        %c2_i32 = arith.constant 2 : i32
        %c0_i32_15 = arith.constant 0 : i32
        %35 = tpu.memref_slice %arg4[%c2_i32, %c0_i32_15] : memref<20x16xf32, #tpu.memory_space<vmem>> -> memref<16x16xf32, #tpu.memory_space<vmem>>
        tpu.enqueue_dma source(%arg2 : memref<16x16xf32, #tpu.memory_space<vmem>>) target(%35 : memref<16x16xf32, #tpu.memory_space<vmem>>) target_semaphore(%34 : memref<!tpu.dma_semaphore, #tpu.memory_space<semaphore_mem>>)
        %c2_i32_16 = arith.constant 2 : i32
        %c0_i32_17 = arith.constant 0 : i32
        %36 = tpu.memref_slice %arg4[%c2_i32_16, %c0_i32_17] : memref<20x16xf32, #tpu.memory_space<vmem>> -> memref<16x16xf32, #tpu.memory_space<vmem>>
        tpu.wait_dma2 semaphore(%34 : memref<!tpu.dma_semaphore, #tpu.memory_space<semaphore_mem>>) src(%arg2 : memref<16x16xf32, #tpu.memory_space<vmem>>) dst(%36 : memref<16x16xf32, #tpu.memory_space<vmem>>)
        tpu.yield
      }) : () -> ()
      %c0_6 = arith.constant 0 : index
      %c0_7 = arith.constant 0 : index
      %12 = vector.load %arg2[%c0_6, %c0_7] : memref<16x16xf32, #tpu.memory_space<vmem>>, vector<1x16xf32>
      %13 = vector.shape_cast %12 : vector<1x16xf32> to vector<1x16xf32>
      %14 = vector.broadcast %13 : vector<1x16xf32> to vector<2x16xf32>
      %c0_8 = arith.constant 0 : index
      %c0_9 = arith.constant 0 : index
      %15 = vector.load %arg4[%c0_8, %c0_9] : memref<20x16xf32, #tpu.memory_space<vmem>>, vector<2x16xf32>
      tpu.vector_store %arg4[%c0_8, %c0_9], %14 {strides = array<i32>} : memref<20x16xf32, #tpu.memory_space<vmem>>, vector<2x16xf32>,
      %c15 = arith.constant 15 : index
      %c0_10 = arith.constant 0 : index
      %16 = vector.load %arg2[%c15, %c0_10] : memref<16x16xf32, #tpu.memory_space<vmem>>, vector<1x16xf32>
      %17 = vector.shape_cast %16 : vector<1x16xf32> to vector<1x16xf32>
      %18 = vector.broadcast %17 : vector<1x16xf32> to vector<2x16xf32>
      %c18 = arith.constant 18 : index
      %c0_11 = arith.constant 0 : index
      %19 = vector.load %arg4[%c18, %c0_11] : memref<20x16xf32, #tpu.memory_space<vmem>>, vector<2x16xf32>
      tpu.vector_store %arg4[%c18, %c0_11], %18 {strides = array<i32>} : memref<20x16xf32, #tpu.memory_space<vmem>>, vector<2x16xf32>,
      %20 = tpu.iota {dimensions = array<i32: 0>} : vector<16x20xi32>
      %21 = tpu.iota {dimensions = array<i32: 1>} : vector<16x20xi32>
      %c1_i32 = arith.constant 1 : i32
      %22 = vector.broadcast %c1_i32 : i32 to vector<16x20xi32>
      %23 = arith.muli %20, %22 : vector<16x20xi32>
      %24 = arith.cmpi sge, %21, %23 : vector<16x20xi32>
      %c1_i32_12 = arith.constant 1 : i32
      %25 = vector.broadcast %c1_i32_12 : i32 to vector<16x20xi32>
      %26 = arith.muli %20, %25 : vector<16x20xi32>
      %c5_i32 = arith.constant 5 : i32
      %27 = vector.broadcast %c5_i32 : i32 to vector<16x20xi32>
      %28 = arith.addi %26, %27 : vector<16x20xi32>
      %29 = arith.cmpi slt, %21, %28 : vector<16x20xi32>
      %30 = arith.andi %24, %29 : vector<16x20xi1>
      %31 = arith.extui %30 : vector<16x20xi1> to vector<16x20xi32>
      %32 = arith.sitofp %31 : vector<16x20xi32> to vector<16x20xf32>
      %c0_13 = arith.constant 0 : index
      %c0_14 = arith.constant 0 : index
      %33 = vector.load %arg5[%c0_13, %c0_14] : memref<16x20xf32, #tpu.memory_space<vmem>>, vector<16x20xf32>
      tpu.vector_store %arg5[%c0_13, %c0_14], %32 {strides = array<i32>} : memref<16x20xf32, #tpu.memory_space<vmem>>, vector<16x20xf32>,
    } else {
    }
    %c16_i32 = arith.constant 16 : i32
    %3 = arith.muli %arg1, %c16_i32 : i32
    %4 = tpu.assume_multiple %3, 16 : i32
    %5 = arith.index_cast %4 : i32 to index
    %c0 = arith.constant 0 : index
    %6 = vector.load %arg4[%5, %c0] : memref<20x16xf32, #tpu.memory_space<vmem>>, vector<20x16xf32>
    %c0_1 = arith.constant 0 : index
    %c0_2 = arith.constant 0 : index
    %7 = vector.load %arg5[%c0_1, %c0_2] : memref<16x20xf32, #tpu.memory_space<vmem>>, vector<16x20xf32>
    %cst = arith.constant dense<0.000000e+00> : vector<16x16xf32>
    %8 = tpu.matmul %7, %6, %cst {dimension_numbers = #tpu.dot_dimension_numbers<[1], [0], [0], [1], [0, 0, 1, 1], [], []>} : vector<16x20xf32>, vector<20x16xf32>, vector<16x16xf32> -> vector<16x16xf32>
    %cst_3 = arith.constant 2.000000e-01 : f32
    %9 = vector.broadcast %cst_3 : f32 to vector<16x16xf32>
    %10 = arith.mulf %8, %9 : vector<16x16xf32>
    %c0_4 = arith.constant 0 : index
    %c0_5 = arith.constant 0 : index
    %11 = vector.load %arg3[%c0_4, %c0_5] : memref<16x16xf32, #tpu.memory_space<vmem>>, vector<16x16xf32>
    tpu.vector_store %arg3[%c0_4, %c0_5], %10 {strides = array<i32>} : memref<16x16xf32, #tpu.memory_space<vmem>>, vector<16x16xf32>,
    return
  }
  func.func @transform_0(%arg0: i32, %arg1: i32) -> (i32, i32) {
    %c0_i32 = arith.constant 0 : i32
    %c0_i32_0 = arith.constant 0 : i32
    return %c0_i32, %arg0 : i32, i32
  }
  func.func @transform_1(%arg0: i32, %arg1: i32) -> (i32, i32) {
    %c0_i32 = arith.constant 0 : i32
    return %arg1, %arg0 : i32, i32
  }
}

</mosaic_0001>

<bundles_post_ra>
// kernel: tpu_custom_call.1
= control target key start
LH: loop header
LB: loop body
LE: loop exit
PB: predicated region body
PF: predicated region fallthrough
CT: control target
= control target key end

     0   :  { %6 = vsyncpa [#allocation5], 0  ;;  %s360_s0 = inlined_call_operand.hbm [shape: f32[16,16], index: 0, kind: input, shape index: {}]   ;;  %s361_s1 = inlined_call_operand.hbm [shape: f32[16,16], index: 1, kind: output, shape index: {}]  }
   0x1   :  { %7 = vsyncpa [#allocation6], 0  ;;  %s311_s6 = smov [#allocation4]   ;;  %s261_s10 = scalar_lea.hbm %s360_s0, 256 }
   0x2   :  { %s13_s7 = sshll.u32 %s311_s6, 4  ;;  %p262_p0 = scmp.ne.s32.totalorder %s360_s0, %s261_s10  ;;  %s14_s7 = int_to_ptr.vmem [resolvable:$true] %s13_s7 }
   0x3   :  { %p265_p1 = scmp.lt.u32.totalorder %s261_s10, %s360_s0 }
   0x5   :  { %p267_p2 = pnand %p265_p1, %p262_p0 }
   0x7   :  { %270 = shalt.err (!%p267_p2)
}
   0x8   :  { %s271_s15 = scalar_lea.vmem %s14_s7, 256  ;;  %p276_p4 = scmp.lt.s32.totalorder %s14_s7, %s14_s7 }
   0x9   :  { %p272_p3 = scmp.ne.s32.totalorder %s14_s7, %s271_s15  ;;  %p277_p5 = scmp.lt.s32.totalorder %s271_s15, %s271_s15 }
   0xb   :  { %p278_p6 = por %p277_p5, %p276_p4 }
   0xd   :  { %p279_p7 = pnand %p278_p6, %p272_p3 }
   0xf   :  { %282 = shalt.err (!%p279_p7)
}
  0x10   :  { %s312_s16 = smov 128   ;;  %s313_s17 = smov 8  }
  0x11   :  { %19 = dma.hbm_to_vmem [thread:$0]  %s360_s0, 256, %s14_s7, [#allocation5], %s312_s16, %s312_s16, %s313_s17  }
  0x12   :  { %305 = dma.done.wait [#allocation5], 256  }
  0x13   :  { %306 = vsyncadd [#allocation5], 4294967040 }
  0x14   :  { %v60_v0 = vld [vmem:[#allocation4] sm:$0xff]  ;;  %v62_v1 = vld [vmem:[#allocation4 + $0x8] sm:$0xff] }
  0x15   :  { %61 = vst [vmem:[#allocation2 + $0x2] sm:$0xff] %v60_v0  ;;  %63 = vst [vmem:[#allocation2 + $0xa] sm:$0xff] %v62_v1 }
  0x16   :  { %71 = vsyncadd [#allocation8], 256 }
  0x17   :  { %307 = dma.done.wait [#allocation8], 256 }
  0x18   :  { %308 = vsyncadd [#allocation8], 4294967040  ;;  %v231_v2 = vld [vmem:[#allocation4] ss:$0 sm:$0xff]  ;;  %vm80_vm0 = vcmask 123904   ;;  %v88_v4 = vlaneseq  ;;  %vm105_vm4 = vcmask 162816  }
  0x19   :  { %v232_v3 = vld [vmem:[#allocation4 + $0xf] ss:$0 sm:$0xff]  ;;  %81 = vst.msk [vmem:[#allocation2] sm:$0x3] %vm80_vm0, %v231_v2  ;;  %v314_v12 = vmov 0.0   ;;  %vm122_vm8 = vcmask 1043456  }
  0x1a   :  { %87 = vst.msk [vmem:[#allocation2 + $0x12] sm:$0x3] %vm80_vm0, %v232_v3  ;;  %v89_v5 = vshrl.u32 %v88_v4, 7  ;;  %v92_v6 = vand.u32 127, %v88_v4  ;;  %s315_s0 = smov [#allocation7]   ;;  %vm203_vm9 = vcmask 130048  }
  0x1b   :  { %s211_s20 = sshll.u32 %s315_s0, 4  ;;  %s212_s20 = int_to_ptr.vmem [resolvable:$true] %s211_s20 }
  0x1c   :  { %v90_v7 = vadd.s32 8, %v89_v5  ;;  %vm93_vm1 = vcmp.ge.s32.totalorder %v92_v6, %v89_v5  ;;  %v95_v8 = vadd.s32 5, %v89_v5  ;;  %v111_v9 = vld [vmem:[#allocation2 + $0x8] sm:$0xff]  ;;  %s283_s21 = scalar_lea.vmem %s212_s20, 256  ;;  %p288_p9 = scmp.lt.s32.totalorder %s212_s20, %s212_s20 }
  0x1d   :  { %p284_p8 = scmp.ne.s32.totalorder %s212_s20, %s283_s21  ;;  %p289_p10 = scmp.lt.s32.totalorder %s283_s21, %s283_s21 }
  0x1e   :  { %vm94_vm2 = vcmp.ge.s32.totalorder %v92_v6, %v90_v7  ;;  %v96_v10 = vadd.s32 5, %v90_v7  ;;  %vm97_vm3 = vcmp.lt.s32.totalorder %v92_v6, %v95_v8 }
  0x1f   :  { %vm99_vm5 = vmand %vm93_vm1, %vm97_vm3  ;;  %p290_p11 = por %p289_p10, %p288_p9 }
  0x20   :  { %v110_v11 = vld [vmem:[#allocation2] sm:$0xff]  ;;  %vm98_vm6 = vcmp.lt.s32.totalorder %v92_v6, %v96_v10  ;;  %v233_v13 = vsel %vm99_vm5, 1.0, %v314_v12 }
  0x21   :  { %v252_v14 = vpack.c.bf16 %v111_v9, %v110_v11  ;;  %vm100_vm7 = vmand %vm94_vm2, %vm98_vm6  ;;  %106 = vst.msk [vmem:[#allocation3] sm:$0xff] %vm105_vm4, %v233_v13  ;;  %v112_v15 = vld [vmem:[#allocation2 + $0x10] sm:$0xf]  ;;  %p291_p12 = pnand %p290_p11, %p284_p8 }
  0x22   :  { %v234_v16 = vsel %vm100_vm7, 1.0, %v314_v12 }
  0x23   :  { %253 = vmatprep.subr.bf16.mxu0 %v252_v14  ;;  %107 = vst.msk [vmem:[#allocation3 + $0x8] sm:$0xff] %vm105_vm4, %v234_v16 }
  0x24   :  { %255 = vmatpush3.bf16.msra.mxu0 %v252_v14 }
  0x25   :  { %247 = vmatprep.subr.msk.mxu0 %vm122_vm8, %v112_v15 }
  0x28   :  { %248 = vmatpush3.msk.msra.mxu0 %vm122_vm8, %v112_v15  ;;  %v113_v17 = vld [vmem:[#allocation3] sm:$0xff] }
  0x29   :  { %249 = vmatprep.mubr.msk.f32.mxu0 %vm105_vm4, %v113_v17 }
  0x2a   :  { %v114_v18 = vld [vmem:[#allocation3 + $0x8] sm:$0xff] }
  0x2b   :  { %250 = vmatmul.mubr.msk.f32.vlgmr.msra.gmra.mrb[0].mxu0 %vm105_vm4, %v114_v18 }
  0xfe   :  { %v251_v19 = vpop.f32.mrb[0].mxu0 }
  0xff   :  { %v202_v20 = vmul.f32 0.2, %v251_v19  ;;  %v192_v21 = vpop.f32.mrb[1].mxu0 }
 0x100   :  { %v201_v22 = vmul.f32 0.2, %v192_v21 }
 0x101   :  { %205 = vst.msk [vmem:[#allocation7 + $0x8] sm:$0xff] %vm203_vm9, %v202_v20 }
 0x102   :  { %204 = vst.msk [vmem:[#allocation7] sm:$0xff] %vm203_vm9, %v201_v22 }
 0x103   :  { %294 = shalt.err (!%p291_p12)
}
 0x104   :  { %s295_s24 = scalar_lea.hbm %s361_s1, 256 }
 0x105   :  { %p296_p13 = scmp.ne.s32.totalorder %s361_s1, %s295_s24  ;;  %p299_p0 = scmp.lt.u32.totalorder %s295_s24, %s361_s1 }
 0x107   :  { %p301_p1 = pnand %p299_p0, %p296_p13 }
 0x109   :  { %304 = shalt.err (!%p301_p1)
}
 0x10a   :  { %217 = dma.vmem_to_hbm [thread:$0]  %s212_s20, 256, %s361_s1, [#allocation6], %s312_s16, %s312_s16, %s313_s17  }
 0x10b   :  { %309 = dma.done.wait [#allocation6], 256  }
 0x10c   :  { %310 = vsyncadd [#allocation6], 4294967040 }
 0x10d   :  { %221 = vsyncpa [#allocation5], 1 }
 0x10e   :  { %222 = vsyncpa [#allocation6], 1 }

</bundles_post_ra>
